<compile_context>
chip_gen: v6e
topology: v6e:2x2x1
jax: 0.10.0
libtpu: 0.0.40
codegen_flags: <defaults>
</compile_context>

<pallas_src>
import functools
import math

import jax
import jax.numpy as jnp
from jax.experimental import pallas as pl
from jax.experimental.pallas import tpu as pltpu


def _se_kernel(x_ref, w1t_ref, b1_ref, w2_ref, b2_ref, o_ref, *, inv_hw):
    # x block: (TM, HW) = (G*C rows, full spatial extent).  Compute in f32.
    x = x_ref[...].astype(jnp.float32)

    # Squeeze: per-row (= per (image, channel)) global average pool.
    # Multiply by a precomputed 1/HW instead of dividing.
    pooled = jnp.sum(x, axis=1, keepdims=True) * inv_hw                      # (TM, 1)

    # Excitation MLP on VPU + XLU only (MXU stays idle, kernel is HBM-bound).
    # Weights are per-group block-diagonal, so all G images of this tile are
    # handled in one shot:
    #   column (TM,1) --sublane-reduce--> row (1,G*Cr) --lane-reduce--> column (TM,1)
    h = jnp.sum(w1t_ref[...] * pooled, axis=0, keepdims=True) + b1_ref[...]  # (1, G*Cr)
    h = jnp.maximum(h, 0.0)                                                  # ReLU
    z = jnp.sum(w2_ref[...] * h, axis=1, keepdims=True) + b2_ref[...]        # (TM, 1)
    s = jax.nn.sigmoid(z)                                                    # (TM, 1)

    # Excite: one broadcast multiply + full-width (lane-dense for HW%128==0) store.
    o_ref[...] = (x * s).astype(o_ref.dtype)


def _round_up(a, b):
    return (a + b - 1) // b * b


def _vmem_budgets():
    """(x-block byte budget, vmem_limit_bytes), gated on physical VMEM size."""
    try:
        info = pltpu.get_tpu_info()
        vmem = int(getattr(info, "vmem_capacity_bytes", 64 * 1024 * 1024))
    except Exception:
        vmem = 64 * 1024 * 1024
    if vmem >= 96 * 1024 * 1024:
        # v5e / v6e: 128 MiB physical VMEM -> bigger tiles cut per-step overhead.
        return 10 * 1024 * 1024, 64 * 1024 * 1024
    # v7x (64 MiB physical): keep 2x(in+out) blocks + weights within 32 MiB scope.
    return 6 * 1024 * 1024, 32 * 1024 * 1024


def _pick_group(N, C, Cr, HW, itemsize, align, x_budget):
    """Images per row tile.

    G*C is sublane aligned for the dtype; both the x block and the kron
    weight blocks stay within their byte budgets; prefer G | N (no batch
    padding) and >= 2 grid steps (megacore) when the batch allows.
    """
    w_budget = 1 * 1024 * 1024          # total bytes for both block-diag weights (f32)
    g0 = align // math.gcd(C, align)    # smallest sublane-aligned whole-image group

    def fits(g):
        x_ok = g * C * HW * itemsize <= x_budget
        w_ok = 2 * (g * C) * (g * Cr) * 4 <= w_budget
        return x_ok and w_ok

    g = g0
    while g < N:
        g2 = g * 2
        if not fits(g2):
            break
        # Keep >= 2 grid steps when possible (v7x has 2 TensorCores).
        if -(-N // g2) < 2 <= -(-N // g):
            break
        g = g2

    # Prefer a group size that divides N (batch padding = an extra HBM pass).
    if N % g != 0:
        gd = g
        while gd > g0 and N % gd != 0:
            gd //= 2
        if N % gd == 0:
            g = gd
    return g


def squeeze_excitation(x, w1, b1, w2, b2):
    """x: (N, C, H, W). w1: (Cr, C), b1: (Cr, 1), w2: (C, Cr), b2: (C, 1)."""
    N, C, H, W = x.shape
    Cr = w1.shape[0]
    HW = H * W
    itemsize = jnp.dtype(x.dtype).itemsize
    align = max(8, 32 // itemsize)       # sublane rows: 8 (f32), 16 (bf16), 32 (int8)

    x_budget, vmem_limit = _vmem_budgets()
    G = _pick_group(N, C, Cr, HW, itemsize, align, x_budget)
    Np = _round_up(N, G)
    TM = G * C                            # rows per tile (multiple of `align`)
    rows = Np * C

    # Flatten to (N*C, HW) — metadata-only reshape.  Pad batch only if required.
    x2 = x.reshape(N * C, HW)
    if Np != N:
        x2 = jnp.pad(x2, ((0, (Np - N) * C), (0, 0)))

    # Per-group block-diagonal weights / tiled biases (tiny, f32, built once in XLA).
    f32 = jnp.float32
    eye_g = jnp.eye(G, dtype=f32)
    w1t_big = jnp.kron(eye_g, w1.astype(f32).T)                 # (G*C, G*Cr)
    b1_big = jnp.tile(b1.astype(f32).reshape(1, Cr), (1, G))    # (1, G*Cr)
    w2_big = jnp.kron(eye_g, w2.astype(f32))                    # (G*C, G*Cr)
    b2_big = jnp.tile(b2.astype(f32).reshape(C, 1), (G, 1))     # (G*C, 1)

    kernel = functools.partial(_se_kernel, inv_hw=float(1.0 / HW))

    w_bytes = (w1t_big.size + w2_big.size + b1_big.size + b2_big.size) * 4
    cost = pl.CostEstimate(
        flops=3 * rows * HW,                       # pool sum + scale multiply (approx)
        transcendentals=rows,                      # one sigmoid per (image, channel)
        bytes_accessed=2 * rows * HW * itemsize + w_bytes,
    )

    out2 = pl.pallas_call(
        kernel,
        out_shape=jax.ShapeDtypeStruct((rows, HW), x.dtype),
        grid_spec=pltpu.PrefetchScalarGridSpec(
            num_scalar_prefetch=0,
            grid=(rows // TM,),
            in_specs=[
                pl.BlockSpec((TM, HW), lambda i: (i, 0)),
                pl.BlockSpec((TM, G * Cr), lambda i: (0, 0)),
                pl.BlockSpec((1, G * Cr), lambda i: (0, 0)),
                pl.BlockSpec((TM, G * Cr), lambda i: (0, 0)),
                pl.BlockSpec((TM, 1), lambda i: (0, 0)),
            ],
            out_specs=pl.BlockSpec((TM, HW), lambda i: (i, 0)),
        ),
        compiler_params=pltpu.CompilerParams(
            dimension_semantics=("parallel",),
            vmem_limit_bytes=vmem_limit,
        ),
        cost_estimate=cost,
    )(x2, w1t_big, b1_big, w2_big, b2_big)

    if Np != N:
        out2 = out2[: N * C]
    return out2.reshape(N, C, H, W)


def _reference(x, w1, b1, w2, b2):
    pooled = jnp.mean(x, axis=(2, 3))                       # (N, C)
    h = jnp.maximum(pooled @ w1.T + b1[:, 0], 0.0)          # (N, Cr)
    s = jax.nn.sigmoid(h @ w2.T + b2[:, 0])                 # (N, C)
    return x * s[:, :, None, None]


if __name__ == "__main__":
    key = jax.random.PRNGKey(0)
    N, C, H, W = 2, 4, 16, 16
    reduction = 2
    Cr = C // reduction

    k_x, k_w1, k_b1, k_w2, k_b2 = jax.random.split(key, 5)
    x = jax.random.normal(k_x, (N, C, H, W), dtype=jnp.float32)
    # 1x1 conv weights == dense matrices over the channel dim.
    w1 = jax.random.normal(k_w1, (Cr, C), dtype=jnp.float32) * 0.5
    b1 = jax.random.normal(k_b1, (Cr, 1), dtype=jnp.float32) * 0.1
    w2 = jax.random.normal(k_w2, (C, Cr), dtype=jnp.float32) * 0.5
    b2 = jax.random.normal(k_b2, (C, 1), dtype=jnp.float32) * 0.1

    out = squeeze_excitation(x, w1, b1, w2, b2)
    jax.block_until_ready(out)

    ref = _reference(x, w1, b1, w2, b2)
    assert out.shape == (N, C, H, W)
    assert jnp.allclose(out, ref, atol=1e-5, rtol=1e-5)

    print("KERNEL_OK")
</pallas_src>

<mosaic_0001>
module attributes {stable_mosaic.version = 11 : i64} {
  func.func @_se_kernel(%arg0: i32, %arg1: memref<8x256xf32, #tpu.memory_space<vmem>>, %arg2: memref<8x4xf32, #tpu.memory_space<vmem>>, %arg3: memref<1x4xf32, #tpu.memory_space<vmem>>, %arg4: memref<8x4xf32, #tpu.memory_space<vmem>>, %arg5: memref<8x1xf32, #tpu.memory_space<vmem>>, %arg6: memref<8x256xf32, #tpu.memory_space<vmem>>) attributes {dimension_semantics = [#tpu.dimension_semantics<parallel>], iteration_bounds = array<i64: 1>, scalar_prefetch = 0 : i64, scratch_operands = 0 : i64, tpu.core_type = #tpu.core_type<tc>, window_params = [{transform_indices = @transform_0, window_bounds = array<i64: 8, 256>}, {pipeline_mode = #tpu.pipeline_mode<synchronous>, transform_indices = @transform_1, window_bounds = array<i64: 8, 4>}, {pipeline_mode = #tpu.pipeline_mode<synchronous>, transform_indices = @transform_2, window_bounds = array<i64: 1, 4>}, {pipeline_mode = #tpu.pipeline_mode<synchronous>, transform_indices = @transform_3, window_bounds = array<i64: 8, 4>}, {pipeline_mode = #tpu.pipeline_mode<synchronous>, transform_indices = @transform_4, window_bounds = array<i64: 8, 1>}, {transform_indices = @transform_5, window_bounds = array<i64: 8, 256>}]} {
    %c0 = arith.constant 0 : index
    %c0_0 = arith.constant 0 : index
    %0 = vector.load %arg1[%c0, %c0_0] : memref<8x256xf32, #tpu.memory_space<vmem>>, vector<8x256xf32>
    %cst = arith.constant dense<0.000000e+00> : vector<8xf32>
    %1 = vector.multi_reduction <add>, %0, %cst [1] : vector<8x256xf32> to vector<8xf32>
    %2 = vector.shape_cast %1 : vector<8xf32> to vector<8x1xf32>
    %cst_1 = arith.constant 3.906250e-03 : f32
    %3 = vector.broadcast %cst_1 : f32 to vector<8x1xf32>
    %4 = arith.mulf %2, %3 : vector<8x1xf32>
    %c0_2 = arith.constant 0 : index
    %c0_3 = arith.constant 0 : index
    %5 = vector.load %arg2[%c0_2, %c0_3] : memref<8x4xf32, #tpu.memory_space<vmem>>, vector<8x4xf32>
    %6 = vector.broadcast %4 : vector<8x1xf32> to vector<8x4xf32>
    %7 = arith.mulf %5, %6 : vector<8x4xf32>
    %cst_4 = arith.constant dense<0.000000e+00> : vector<4xf32>
    %8 = vector.multi_reduction <add>, %7, %cst_4 [0] : vector<8x4xf32> to vector<4xf32>
    %9 = vector.shape_cast %8 : vector<4xf32> to vector<1x4xf32>
    %c0_5 = arith.constant 0 : index
    %c0_6 = arith.constant 0 : index
    %10 = vector.load %arg3[%c0_5, %c0_6] : memref<1x4xf32, #tpu.memory_space<vmem>>, vector<1x4xf32>
    %11 = arith.addf %9, %10 : vector<1x4xf32>
    %cst_7 = arith.constant 0.000000e+00 : f32
    %12 = vector.broadcast %cst_7 : f32 to vector<1x4xf32>
    %13 = arith.maximumf %11, %12 : vector<1x4xf32>
    %c0_8 = arith.constant 0 : index
    %c0_9 = arith.constant 0 : index
    %14 = vector.load %arg4[%c0_8, %c0_9] : memref<8x4xf32, #tpu.memory_space<vmem>>, vector<8x4xf32>
    %15 = vector.broadcast %13 : vector<1x4xf32> to vector<8x4xf32>
    %16 = arith.mulf %14, %15 : vector<8x4xf32>
    %cst_10 = arith.constant dense<0.000000e+00> : vector<8xf32>
    %17 = vector.multi_reduction <add>, %16, %cst_10 [1] : vector<8x4xf32> to vector<8xf32>
    %18 = vector.shape_cast %17 : vector<8xf32> to vector<8x1xf32>
    %c0_11 = arith.constant 0 : index
    %c0_12 = arith.constant 0 : index
    %19 = vector.load %arg5[%c0_11, %c0_12] : memref<8x1xf32, #tpu.memory_space<vmem>>, vector<8x1xf32>
    %20 = arith.addf %18, %19 : vector<8x1xf32>
    %21 = arith.negf %20 : vector<8x1xf32>
    %22 = math.exp %21 : vector<8x1xf32>
    %cst_13 = arith.constant 1.000000e+00 : f32
    %23 = vector.broadcast %cst_13 : f32 to vector<8x1xf32>
    %24 = arith.addf %23, %22 : vector<8x1xf32>
    %25 = arith.divf %23, %24 : vector<8x1xf32>
    %26 = vector.broadcast %25 : vector<8x1xf32> to vector<8x256xf32>
    %27 = arith.mulf %0, %26 : vector<8x256xf32>
    %c0_14 = arith.constant 0 : index
    %c0_15 = arith.constant 0 : index
    %28 = vector.load %arg6[%c0_14, %c0_15] : memref<8x256xf32, #tpu.memory_space<vmem>>, vector<8x256xf32>
    tpu.vector_store %arg6[%c0_14, %c0_15], %27 {strides = array<i32>} : memref<8x256xf32, #tpu.memory_space<vmem>>, vector<8x256xf32>,
    return
  }
  func.func @transform_0(%arg0: i32) -> (i32, i32) {
    %c0_i32 = arith.constant 0 : i32
    %c0_i32_0 = arith.constant 0 : i32
    return %arg0, %c0_i32 : i32, i32
  }
  func.func @transform_1(%arg0: i32) -> (i32, i32) {
    %c0_i32 = arith.constant 0 : i32
    %c0_i32_0 = arith.constant 0 : i32
    %c0_i32_1 = arith.constant 0 : i32
    return %c0_i32, %c0_i32_0 : i32, i32
  }
  func.func @transform_2(%arg0: i32) -> (i32, i32) {
    %c0_i32 = arith.constant 0 : i32
    %c0_i32_0 = arith.constant 0 : i32
    %c0_i32_1 = arith.constant 0 : i32
    return %c0_i32, %c0_i32_0 : i32, i32
  }
  func.func @transform_3(%arg0: i32) -> (i32, i32) {
    %c0_i32 = arith.constant 0 : i32
    %c0_i32_0 = arith.constant 0 : i32
    %c0_i32_1 = arith.constant 0 : i32
    return %c0_i32, %c0_i32_0 : i32, i32
  }
  func.func @transform_4(%arg0: i32) -> (i32, i32) {
    %c0_i32 = arith.constant 0 : i32
    %c0_i32_0 = arith.constant 0 : i32
    %c0_i32_1 = arith.constant 0 : i32
    return %c0_i32, %c0_i32_0 : i32, i32
  }
  func.func @transform_5(%arg0: i32) -> (i32, i32) {
    %c0_i32 = arith.constant 0 : i32
    %c0_i32_0 = arith.constant 0 : i32
    return %arg0, %c0_i32 : i32, i32
  }
}

</mosaic_0001>

<bundles_post_ra>
// kernel: tpu_custom_call.1
= control target key start
LH: loop header
LB: loop body
LE: loop exit
PB: predicated region body
PF: predicated region fallthrough
CT: control target
= control target key end

     0   :  { %s166_s0 = inlined_call_operand.vmem [shape: f32[8,256], index: 0, kind: input, shape index: {}]   ;;  %s167_s1 = inlined_call_operand.vmem [shape: f32[8,4], index: 1, kind: input, shape index: {}]   ;;  %s168_s2 = inlined_call_operand.vmem [shape: f32[1,4], index: 2, kind: input, shape index: {}]   ;;  %s169_s3 = inlined_call_operand.vmem [shape: f32[8,4], index: 3, kind: input, shape index: {}]   ;;  %s170_s4 = inlined_call_operand.vmem [shape: f32[8,1], index: 4, kind: input, shape index: {}]   ;;  %s171_s5 = inlined_call_operand.hbm [shape: f32[8,256], index: 5, kind: output, shape index: {}]  }
   0x1   :  { %v21_v0 = vld [vmem:[%s166_s0] sm:$0xff]  ;;  %v22_v1 = vld [vmem:[%s166_s0 + $0x8] sm:$0xff] }
   0x2   :  { %v23_v2 = vadd.f32 %v22_v1, %v21_v0 }
   0x3   :  { %10 = vsyncpa [#allocation3], 0  ;;  %v27_v3 = vld [vmem:[%s167_s1] sm:$0xff]  ;;  %vm29_vm0 = vcmask 31744   ;;  %v41_v11 = vlaneseq  ;;  %v111_v24 = vmov 0  }
   0x4   :  { %24 = vadd.xlane.f32.xlu0 %v23_v2  ;;  %v37_v15 = vld [vmem:[%s168_s2] sm:$0x1]  ;;  %83 = vset.pattern.permute.xlu1 %v111_v24  ;;  %s112_s2 = smov [#allocation2]  }
   0x5   :  { %v42_v14 = vshrl.u32 %v41_v11, 7  ;;  %v40_v20 = vld [vmem:[%s169_s3] sm:$0xff]  ;;  %84 = vset.pattern.permute.xlu0 %v111_v24  ;;  %s72_s3 = sshll.u32 %s112_s2, 4  ;;  %s73_s3 = int_to_ptr.vmem [resolvable:$true] %s72_s3 }
   0x6   :  { %v49_v25 = vld [vmem:[%s170_s4] sm:$0xff]  ;;  %s89_s28 = scalar_lea.vmem %s73_s3, 256  ;;  %p94_p1 = scmp.lt.s32.totalorder %s73_s3, %s73_s3 }
   0x7   :  { %v43_v18 = vsub.s32 0, %v42_v14  ;;  %p90_p0 = scmp.ne.s32.totalorder %s73_s3, %s89_s28  ;;  %p95_p2 = scmp.lt.s32.totalorder %s89_s28, %s89_s28 }
   0x9   :  { %p96_p3 = por %p95_p2, %p94_p1 }
   0xb   :  { %p97_p4 = pnand %p96_p3, %p90_p0 }
  0x8d   :  { %v25_v4 = vpop.xlane.xlu0 %24 }
  0x8e   :  { %v26_v5 = vmul.f32 0.00390625, %v25_v4 }
  0x90   :  { %v28_v6 = vmul.f32 %v27_v3, %v26_v5 }
  0x92   :  { %v30_v7 = vsel %vm29_vm0, %v28_v6, 0.0 }
  0x93   :  { %v31_v8 = vrot.slane %v30_v7, 4 }
  0x95   :  { %v32_v9 = vadd.f32 %v31_v8, %v30_v7 }
  0x97   :  { %v33_v10 = vrot.slane %v32_v9, 2 }
  0x99   :  { %v34_v12 = vadd.f32 %v33_v10, %v32_v9 }
  0x9b   :  { %v35_v13 = vrot.slane %v34_v12, 1 }
  0x9d   :  { %v36_v16 = vadd.f32 %v35_v13, %v34_v12 }
  0x9f   :  { %v38_v17 = vadd.f32 %v37_v15, %v36_v16 }
  0xa1   :  { %v39_v19 = vmax.f32 %v38_v17, 0.0 }
  0xa3   :  { %v44_v21 = vrot.slane %v39_v19, %v43_v18 }
  0xa5   :  { %v45_v22 = vmul.f32 %v44_v21, %v40_v20 }
  0xa7   :  { %v46_v23 = vsel %vm29_vm0, %v45_v22, 0.0 }
  0xa8   :  { %47 = vadd.xlane.f32.xlu0 %v46_v23 }
 0x131   :  { %v48_v26 = vpop.xlane.xlu0 %47 }
 0x132   :  { %v50_v27 = vadd.f32 %v49_v25, %v48_v26 }
 0x134   :  { %v80_v28 = vmul.f32 -1.442695, %v50_v27 }
 0x136   :  { %85 = vpow2.f32 %v80_v28 }
 0x143   :  { %v86_v29 = vpop.eup %85 }
 0x144   :  { %v54_v30 = vadd.f32 1.0, %v86_v29 }
 0x146   :  { %87 = vrcp.f32 %v54_v30 }
 0x153   :  { %v88_v31 = vpop.eup %87 }
 0x154   :  { %59 = vperm.xlu1 %83, %v88_v31  }
 0x1cf   :  { %v60_v32 = vpop.permute.xlu1 %59 }
 0x1d0   :  { %v62_v33 = vmul.f32 %v60_v32, %v21_v0  ;;  %v63_v34 = vmul.f32 %v60_v32, %v22_v1 }
 0x1d2   :  { %64 = vst [vmem:[#allocation2] sm:$0xff] %v62_v33  ;;  %65 = vst [vmem:[#allocation2 + $0x8] sm:$0xff] %v63_v34 }
 0x1d3   :  { %100 = shalt.err (!%p97_p4)
}
 0x1d4   :  { %75 = dma.vmem_to_hbm [thread:$0]  %s73_s3, 256, %s171_s5, [#allocation3]  }
 0x1d5   :  { %109 = dma.done.wait [#allocation3], 256  }
 0x1d6   :  { %110 = vsyncadd [#allocation3], 4294967040 }
 0x1d7   :  { %79 = vsyncpa [#allocation3], 1 }

</bundles_post_ra>
